<compile_context>
chip_gen: v7x
topology: tpu7x:2x2x1
jax: 0.10.0
libtpu: 0.0.40
codegen_flags: <defaults>
</compile_context>

<pallas_src>
import jax
import jax.numpy as jnp
from jax.experimental import pallas as pl
from jax.experimental.pallas import tpu as pltpu


def bilinear_matrix(in_size: int, out_size: int) -> jnp.ndarray:
    """(out_size, in_size) interpolation matrix for bilinear, align_corners=True."""
    i = jnp.arange(out_size, dtype=jnp.float32)
    src = i * (in_size - 1) / (out_size - 1)
    i0 = jnp.clip(jnp.floor(src).astype(jnp.int32), 0, in_size - 2)
    i1 = i0 + 1
    w1 = src - i0.astype(jnp.float32)
    w0 = 1.0 - w1
    rows = jnp.arange(out_size)
    m = jnp.zeros((out_size, in_size), jnp.float32)
    m = m.at[rows, i0].add(w0)
    m = m.at[rows, i1].add(w1)
    return m


def _segnet_head_kernel(x_ref, w_ref, b_ref, m_ref, o_ref):
    # x_ref: (1, Cin, HW)   bf16  one image's backbone features, channel-major
    # w_ref: (Cp, Cin)      bf16  1x1-conv weight, Cout zero-padded to Cp rows
    # b_ref: (Cp, 1)        f32   bias (padded)
    # m_ref: (HW, HoWo)     f32   kron(wy, wx)^T bilinear upsample matrix
    # o_ref: (1, Cp, HoWo)  f32   channel-major upsampled logits
    feat = jnp.dot(w_ref[...], x_ref[0],
                   preferred_element_type=jnp.float32)          # (Cp, HW)
    feat = feat + b_ref[...]                                    # bias (broadcast over HW)
    o_ref[0] = jnp.dot(feat, m_ref[...],
                       preferred_element_type=jnp.float32)      # (Cp, HoWo)


def segnet_head(x_nchw, w_oc, b_o, out_size=(32, 32)):
    """x_nchw: [N, 2048, H, W] backbone features -> [N, 21, Ho, Wo] logits (NCHW)."""
    N, Cin, H, W = x_nchw.shape
    Cout = w_oc.shape[0]
    Cp = 8 * ((Cout + 7) // 8)          # 24: sublane-aligned padded output channels
    Ho, Wo = out_size
    HW = H * W
    HoWo = Ho * Wo

    # Channel-major activations (this is just NCHW with the trailing spatial dims
    # flattened -> natural memory order, no transpose), cast to bf16.
    x_flat = x_nchw.reshape(N, Cin, HW).astype(jnp.bfloat16)

    w_pad = jnp.zeros((Cp, Cin), jnp.bfloat16).at[:Cout].set(w_oc.astype(jnp.bfloat16))
    b_pad = jnp.zeros((Cp, 1), jnp.float32).at[:Cout, 0].set(b_o.astype(jnp.float32))

    # Single (HW, Ho*Wo) upsample matrix: M[h*W+w, i*Wo+j] = wy[i,h] * wx[j,w].
    wy = bilinear_matrix(H, Ho)
    wx = bilinear_matrix(W, Wo)
    m_up_t = jnp.kron(wy, wx).T                                  # (HW, HoWo), f32

    flops = 2 * N * Cp * Cin * HW + 2 * N * Cp * HW * HoWo
    bytes_accessed = (x_flat.size * 2 + w_pad.size * 2 + b_pad.size * 4
                      + m_up_t.size * 4 + N * Cp * HoWo * 4)

    # NOTE: one image per grid step keeps grid=(N,) "parallel" so both v7x TensorCores
    # are used at N=2; for large N on v5e/v6e, batch 2-4 images per block to fill the
    # MXU M dimension and amortize per-step overhead.
    out = pl.pallas_call(
        _segnet_head_kernel,
        out_shape=jax.ShapeDtypeStruct((N, Cp, HoWo), jnp.float32),
        grid_spec=pltpu.PrefetchScalarGridSpec(
            num_scalar_prefetch=0,
            grid=(N,),
            in_specs=[
                pl.BlockSpec((1, Cin, HW), lambda n: (n, 0, 0)),
                pl.BlockSpec((Cp, Cin), lambda n: (0, 0)),
                pl.BlockSpec((Cp, 1), lambda n: (0, 0)),
                pl.BlockSpec((HW, HoWo), lambda n: (0, 0)),
            ],
            out_specs=pl.BlockSpec((1, Cp, HoWo), lambda n: (n, 0, 0)),
        ),
        compiler_params=pltpu.CompilerParams(
            dimension_semantics=("parallel",)),
        cost_estimate=pl.CostEstimate(
            flops=flops, transcendentals=0, bytes_accessed=bytes_accessed),
    )(x_flat, w_pad, b_pad, m_up_t)

    # (N, Cp, Ho*Wo) channel-major slab -> PyTorch NCHW logits.
    return out[:, :Cout, :].reshape(N, Cout, Ho, Wo)


def segnet_head_ref_f32(x, w, b, out_size=(32, 32)):
    """Pure-JAX f32 reference (exact PyTorch semantics)."""
    y = jnp.einsum('oc,nchw->nohw', w, x) + b[None, :, None, None]
    wy = bilinear_matrix(x.shape[2], out_size[0])
    wx = bilinear_matrix(x.shape[3], out_size[1])
    return jnp.einsum('ih,nohw,jw->noij', wy, y, wx)


def segnet_head_ref_bf16(x, w, b, out_size=(32, 32)):
    """Reference mirroring the kernel's bf16 operand rounding (f32 accumulation)."""
    y = jnp.einsum('oc,nchw->nohw', w.astype(jnp.bfloat16), x.astype(jnp.bfloat16),
                   preferred_element_type=jnp.float32) + b[None, :, None, None]
    wy = bilinear_matrix(x.shape[2], out_size[0])
    wx = bilinear_matrix(x.shape[3], out_size[1])
    return jnp.einsum('ih,nohw,jw->noij', wy, y, wx)


if __name__ == "__main__":
    key = jax.random.PRNGKey(0)
    k_x, k_w, k_b = jax.random.split(key, 3)

    # Backbone output for a 2-image batch (ResNet stride-32 features).
    N, Cin, H, W = 2, 2048, 8, 8
    Cout = 21
    x = jax.random.normal(k_x, (N, Cin, H, W), jnp.float32)

    # Deterministic Conv2d(2048, 21, 1) parameters (PyTorch-style uniform bound).
    bound = 1.0 / float(Cin) ** 0.5
    w = jax.random.uniform(k_w, (Cout, Cin), jnp.float32, -bound, bound)
    b = jax.random.uniform(k_b, (Cout,), jnp.float32, -bound, bound)

    out = segnet_head(x, w, b)
    out = jax.block_until_ready(out)
    assert out.shape == (N, Cout, 32, 32), out.shape

    # Strict check against the bf16-operand-matched reference.
    ref16 = segnet_head_ref_bf16(x, w, b)
    err16 = float(jnp.max(jnp.abs(out - ref16)))
    assert jnp.allclose(out, ref16, rtol=2e-3, atol=2e-3), err16

    # Loose semantics check against the pure-f32 reference (bf16 input rounding only).
    ref32 = segnet_head_ref_f32(x, w, b)
    err32 = float(jnp.max(jnp.abs(out - ref32)))
    assert jnp.allclose(out, ref32, rtol=2e-2, atol=2e-2), err32

    print("KERNEL_OK")
</pallas_src>

<mosaic_0001>
module attributes {stable_mosaic.version = 11 : i64} {
  func.func @_segnet_head_kernel(%arg0: i32, %arg1: memref<1x2048x64xbf16, #tpu.memory_space<vmem>>, %arg2: memref<24x2048xbf16, #tpu.memory_space<vmem>>, %arg3: memref<24x1xf32, #tpu.memory_space<vmem>>, %arg4: memref<64x1024xf32, #tpu.memory_space<vmem>>, %arg5: memref<1x24x1024xf32, #tpu.memory_space<vmem>>) attributes {dimension_semantics = [#tpu.dimension_semantics<parallel>], iteration_bounds = array<i64: 2>, scalar_prefetch = 0 : i64, scratch_operands = 0 : i64, tpu.core_type = #tpu.core_type<tc>, window_params = [{transform_indices = @transform_0, window_bounds = array<i64: 1, 2048, 64>}, {pipeline_mode = #tpu.pipeline_mode<synchronous>, transform_indices = @transform_1, window_bounds = array<i64: 24, 2048>}, {pipeline_mode = #tpu.pipeline_mode<synchronous>, transform_indices = @transform_2, window_bounds = array<i64: 24, 1>}, {pipeline_mode = #tpu.pipeline_mode<synchronous>, transform_indices = @transform_3, window_bounds = array<i64: 64, 1024>}, {transform_indices = @transform_4, window_bounds = array<i64: 1, 24, 1024>}]} {
    %c0 = arith.constant 0 : index
    %c0_0 = arith.constant 0 : index
    %0 = vector.load %arg2[%c0, %c0_0] : memref<24x2048xbf16, #tpu.memory_space<vmem>>, vector<24x2048xbf16>
    %c0_1 = arith.constant 0 : index
    %c0_2 = arith.constant 0 : index
    %c0_3 = arith.constant 0 : index
    %1 = vector.load %arg1[%c0_1, %c0_2, %c0_3] : memref<1x2048x64xbf16, #tpu.memory_space<vmem>>, vector<1x2048x64xbf16>
    %2 = vector.shape_cast %1 : vector<1x2048x64xbf16> to vector<2048x64xbf16>
    %cst = arith.constant dense<0.000000e+00> : vector<24x64xf32>
    %3 = tpu.matmul %0, %2, %cst {dimension_numbers = #tpu.dot_dimension_numbers<[1], [0], [0], [1], [0, 0, 1, 1], [], []>} : vector<24x2048xbf16>, vector<2048x64xbf16>, vector<24x64xf32> -> vector<24x64xf32>
    %c0_4 = arith.constant 0 : index
    %c0_5 = arith.constant 0 : index
    %4 = vector.load %arg3[%c0_4, %c0_5] : memref<24x1xf32, #tpu.memory_space<vmem>>, vector<24x1xf32>
    %5 = vector.broadcast %4 : vector<24x1xf32> to vector<24x64xf32>
    %6 = arith.addf %3, %5 : vector<24x64xf32>
    %c0_6 = arith.constant 0 : index
    %c0_7 = arith.constant 0 : index
    %7 = vector.load %arg4[%c0_6, %c0_7] : memref<64x1024xf32, #tpu.memory_space<vmem>>, vector<64x1024xf32>
    %cst_8 = arith.constant dense<0.000000e+00> : vector<24x1024xf32>
    %8 = tpu.matmul %6, %7, %cst_8 {dimension_numbers = #tpu.dot_dimension_numbers<[1], [0], [0], [1], [0, 0, 1, 1], [], []>} : vector<24x64xf32>, vector<64x1024xf32>, vector<24x1024xf32> -> vector<24x1024xf32>
    %c0_9 = arith.constant 0 : index
    %c0_10 = arith.constant 0 : index
    %c0_11 = arith.constant 0 : index
    %9 = vector.load %arg5[%c0_9, %c0_10, %c0_11] : memref<1x24x1024xf32, #tpu.memory_space<vmem>>, vector<1x24x1024xf32>
    %10 = vector.shape_cast %9 : vector<1x24x1024xf32> to vector<24x1024xf32>
    %11 = vector.shape_cast %8 : vector<24x1024xf32> to vector<1x24x1024xf32>
    tpu.vector_store %arg5[%c0_9, %c0_10, %c0_11], %11 {strides = array<i32>} : memref<1x24x1024xf32, #tpu.memory_space<vmem>>, vector<1x24x1024xf32>,
    return
  }
  func.func @transform_0(%arg0: i32) -> (i32, i32, i32) {
    %c0_i32 = arith.constant 0 : i32
    %c0_i32_0 = arith.constant 0 : i32
    %c0_i32_1 = arith.constant 0 : i32
    return %arg0, %c0_i32, %c0_i32_0 : i32, i32, i32
  }
  func.func @transform_1(%arg0: i32) -> (i32, i32) {
    %c0_i32 = arith.constant 0 : i32
    %c0_i32_0 = arith.constant 0 : i32
    %c0_i32_1 = arith.constant 0 : i32
    return %c0_i32, %c0_i32_0 : i32, i32
  }
  func.func @transform_2(%arg0: i32) -> (i32, i32) {
    %c0_i32 = arith.constant 0 : i32
    %c0_i32_0 = arith.constant 0 : i32
    %c0_i32_1 = arith.constant 0 : i32
    return %c0_i32, %c0_i32_0 : i32, i32
  }
  func.func @transform_3(%arg0: i32) -> (i32, i32) {
    %c0_i32 = arith.constant 0 : i32
    %c0_i32_0 = arith.constant 0 : i32
    %c0_i32_1 = arith.constant 0 : i32
    return %c0_i32, %c0_i32_0 : i32, i32
  }
  func.func @transform_4(%arg0: i32) -> (i32, i32, i32) {
    %c0_i32 = arith.constant 0 : i32
    %c0_i32_0 = arith.constant 0 : i32
    %c0_i32_1 = arith.constant 0 : i32
    return %arg0, %c0_i32, %c0_i32_0 : i32, i32, i32
  }
}

</mosaic_0001>

<bundles_post_ra>
// kernel: tpu_custom_call.1
= control target key start
LH: loop header
LB: loop body
LE: loop exit
PB: predicated region body
PF: predicated region fallthrough
CT: control target
= control target key end

     0   :  { %9 = vsyncpa [#allocation3], 0  ;;  %s3668_s0 = inlined_call_operand.vmem [shape: bf16[2,2048,64], index: 0, kind: input, shape index: {}]   ;;  %s3669_s1 = inlined_call_operand.vmem [shape: bf16[24,2048], index: 1, kind: input, shape index: {}]   ;;  %s3670_s2 = inlined_call_operand.vmem [shape: f32[24,1], index: 2, kind: input, shape index: {}]   ;;  %s3671_s3 = inlined_call_operand.vmem [shape: f32[64,1024], index: 3, kind: input, shape index: {}]   ;;  %s3672_s4 = inlined_call_operand.hbm [shape: f32[2,24,1024], index: 4, kind: output, shape index: {}]  }
   0x1   :  { %11 = vsyncpa [#allocation3 + $0x1], 0  ;;  %s3044_s15 = smov 0   ;;  %s3046_s16 = smov 0  }
   0x2   :  { %s3048_s17 = smov 0   ;;  %s3050_s18 = smov 0  }
   0x3 LB: > { %s3065_s19 = sadd.s32 4294967295, %s3012_s18   ;;  %s2289_s20 = sadd.s32 4294967294, %s3012_s18   ;;  %s3012_s18 = sphi %s3050_s18, %s3678_s18   ;;  %s3008_s17 = sphi %s3048_s17, %s3677_s17   ;;  %s3004_s16 = sphi %s3046_s16, %s3676_s16   ;;  %s3000_s15 = sphi %s3044_s15, %s3675_s15  }
   0x4   : > { %s3069_s21 = sadd.s32 1, %s3012_s18   ;;  %s113_s22 = sadd.s32 1, %s3008_s17 }
   0x5   : > { %s110_s23 = ssub.s32 %s3012_s18, %s3069_s21  ;;  %p123_p0 = scmp.ne.s32.totalorder %s3008_s17, %s3004_s16 }
   0x6   : > { %p111_p1 = scmp.eq.s32.totalorder %s110_s23, 0  ;;  %p124_p2 = scmp.eq.s32.totalorder %s3065_s19, 1 }
   0x7   : > { %p129_p3 = scmp.ne.s32.totalorder %s3004_s16, %s3000_s15  ;;  %p130_p4 = scmp.eq.s32.totalorder %s2289_s20, 1 }
   0x8   : > { %s3080_s24 = scalar_select %p111_p1, %s3008_s17, %s113_s22  }
   0x9   : > { %p3082_p5 = por %p124_p2, %p123_p0  ;;  %p3086_p6 = por %p130_p4, %p129_p3 }
   0xa   : > { %p2292_p7 = scmp.ge.s32.totalorder %s3012_s18, 1  ;;  %p165_p8 = scmp.lt.s32.totalorder %s3012_s18, 3 }
   0xc   : > { %p166_p9 = pnand %p2292_p7, %p165_p8 }
   0xd   : > { %p191_p10 = scmp.lt.s32.totalorder (!%p166_p9), %s3065_s19, 1  ;;  %v3096_v0 = vld [vmem:[%s3669_s1] sm:$0xff] (!%p166_p9)  ;;  %v3106_v2 = vld [vmem:[%s3669_s1 + $0x8] sm:$0xff] (!%p166_p9)  ;;  %v3014_v5 = vmov (!%p166_p9), 0   ;;  %v3173_v50 = vld [vmem:[%s3669_s1 + $0x10] sm:$0xff] (!%p166_p9)  ;;  %vm1847_vm0 = vcmask (!%p166_p9), 523264  }
   0xe   : > { %169 = sbr.rel (%p166_p9) target bundleno = 626 (0x272), region = 36  ;;  %v3101_v1 = vld [vmem:[%s3669_s1 + $0x40] sm:$0xff] (!%p166_p9)  ;;  %v3113_v4 = vld [vmem:[%s3669_s1 + $0x48] sm:$0xff] (!%p166_p9)  ;;  %2804 = vset.pattern.permute.xlu0 (!%p166_p9), %v3014_v5  ;;  %2805 = vset.pattern.permute.xlu1 (!%p166_p9), %v3014_v5  ;;  %v3178_v51 = vld [vmem:[%s3669_s1 + $0x50] sm:$0xff] (!%p166_p9)  ;;  %s188_s29 = sand.u32 (!%p166_p9), 1, %s3004_s16  }
   0xf   : > { %v2296_v3 = vcombine.high (!%p166_p9), %v3096_v0, %v3101_v1  ;;  %v2298_v6 = vcombine.high (!%p166_p9), %v3106_v2, %v3113_v4  ;;  %v213_v36 = vld [vmem:[%s3669_s1 + $0x80] sm:$0xff] (!%p166_p9)  ;;  %v214_v38 = vld [vmem:[%s3669_s1 + $0x88] sm:$0xff] (!%p166_p9)  ;;  %v2295_v41 = vcombine.low (!%p166_p9), %v3096_v0, %v3101_v1  ;;  %v2297_v42 = vcombine.low (!%p166_p9), %v3106_v2, %v3113_v4  ;;  %v3184_v53 = vld [vmem:[%s3669_s1 + $0x18] sm:$0xff] (!%p166_p9)  ;;  %s2759_s30 = smul.u32 (!%p166_p9), 192, %s188_s29  ;;  %s3016_s11 = smov (!%p166_p9), [#allocation2]  }
  0x10   : > { %v2312_v45 = vcombine.high (!%p166_p9), %v213_v36, %v213_v36  ;;  %v2314_v47 = vcombine.high (!%p166_p9), %v214_v38, %v214_v38  ;;  %v3189_v54 = vld [vmem:[%s3669_s1 + $0x58] sm:$0xff] (!%p166_p9)  ;;  %v2311_v57 = vcombine.low (!%p166_p9), %v213_v36, %v213_v36  ;;  %v2313_v59 = vcombine.low (!%p166_p9), %v214_v38, %v214_v38  ;;  %v3255_v36 = vld [vmem:[%s3669_s1 + $0x68] sm:$0xff] (!%p166_p9)  ;;  %s2760_s5 = smul.u32 (!%p166_p9), 3072, %s3065_s19  ;;  %s2954_s12 = sshll.u32 (!%p166_p9), %s3016_s11, 4  ;;  %s2955_s12 = int_to_ptr.vmem [resolvable:$false] %s2954_s12 }
  0x11   : > { %1431 = vmatprep.mubr.bf16.mxu0 (!%p166_p9), %v2296_v3  ;;  %1479 = vmatprep.mubr.bf16.mxu1 (!%p166_p9), %v2298_v6  ;;  %v2300_v61 = vcombine.high (!%p166_p9), %v3173_v50, %v3178_v51  ;;  %v2302_v63 = vcombine.high (!%p166_p9), %v3184_v53, %v3189_v54  ;;  %s2956_s14 = scalar_lea.vmem (!%p166_p9), %s2955_s12, 6144 }
  0x15   : > { %s192_s9 = scalar_select %p191_p10, %s3065_s19, 1 }
  0x16   : > { %s3627_s19 = scalar_lea.sflag [#allocation3], %s188_s29 }
  0x17   : > { %s2470_s10 = sshll.u32 %s192_s9, 10  ;;  %s3617_s9 = scalar_lea.hbm %s3672_s4, %s2760_s5 }
  0x18   : > { %s3121_s13 = scalar_lea.vmem %s3668_s0, %s2470_s10 }
  0x19   : > { %v2806_v7 = vld [vmem:[%s3121_s13 + $0x40] sm:$0xff]   ;;  %v2810_v11 = vld [vmem:[%s3121_s13 + $0x48] sm:$0xff]   ;;  %v2814_v15 = vld [vmem:[%s3121_s13 + $0x50] sm:$0xff]  }
  0x1a   : > { %v2807_v8 = vld [vmem:[%s3121_s13 + $0xc0] sm:$0xff]   ;;  %2471 = vmatprep.subr.bf16.mxu0 %v2806_v7  ;;  %v2811_v12 = vld [vmem:[%s3121_s13 + $0xc8] sm:$0xff]   ;;  %v2815_v16 = vld [vmem:[%s3121_s13 + $0xd0] sm:$0xff]  }
  0x1b   : > { %v2808_v9 = vld [vmem:[%s3121_s13] sm:$0xff]   ;;  %2499 = vmatprep.subr.bf16.mxu1 %v2807_v8  ;;  %v2812_v13 = vld [vmem:[%s3121_s13 + $0x8] sm:$0xff]   ;;  %v2816_v17 = vld [vmem:[%s3121_s13 + $0x10] sm:$0xff]  }
  0x1c   : > { %v2809_v10 = vld [vmem:[%s3121_s13 + $0x80] sm:$0xff]   ;;  %2472 = vmatpush3.bf16.msra.mxu0 %v2808_v9  ;;  %v2813_v14 = vld [vmem:[%s3121_s13 + $0x88] sm:$0xff]   ;;  %v2817_v18 = vld [vmem:[%s3121_s13 + $0x90] sm:$0xff]  }
  0x1d   : > { %2500 = vmatpush3.bf16.msra.mxu1 %v2809_v10  ;;  %2473 = vmatprep.subr.bf16.mxu0 %v2810_v11  ;;  %v2818_v19 = vld [vmem:[%s3121_s13 + $0x58] sm:$0xff]   ;;  %v2822_v23 = vld [vmem:[%s3121_s13 + $0x60] sm:$0xff]   ;;  %v2826_v27 = vld [vmem:[%s3121_s13 + $0x68] sm:$0xff]  }
  0x1e   : > { %2501 = vmatprep.subr.bf16.mxu1 %v2811_v12  ;;  %v2819_v20 = vld [vmem:[%s3121_s13 + $0xd8] sm:$0xff]   ;;  %v2823_v24 = vld [vmem:[%s3121_s13 + $0xe0] sm:$0xff]   ;;  %v2827_v28 = vld [vmem:[%s3121_s13 + $0xe8] sm:$0xff]  }
  0x1f   : > { %v2820_v21 = vld [vmem:[%s3121_s13 + $0x18] sm:$0xff]   ;;  %v2824_v25 = vld [vmem:[%s3121_s13 + $0x20] sm:$0xff]   ;;  %v2828_v29 = vld [vmem:[%s3121_s13 + $0x28] sm:$0xff]  }
  0x20   : > { %2474 = vmatpush3.bf16.msra.mxu0 %v2812_v13  ;;  %v2821_v22 = vld [vmem:[%s3121_s13 + $0x98] sm:$0xff]   ;;  %v2825_v26 = vld [vmem:[%s3121_s13 + $0xa0] sm:$0xff]   ;;  %v2829_v30 = vld [vmem:[%s3121_s13 + $0xa8] sm:$0xff]  }
  0x21   : > { %2502 = vmatpush3.bf16.msra.mxu1 %v2813_v14  ;;  %2475 = vmatprep.subr.bf16.mxu0 %v2814_v15  ;;  %v2830_v31 = vld [vmem:[%s3121_s13 + $0x70] sm:$0xff]   ;;  %v2834_v35 = vld [vmem:[%s3121_s13 + $0x78] sm:$0xff]   ;;  %v2838_v43 = vld [vmem:[%s3121_s13 + $0x140] sm:$0xff]  }
  0x22   : > { %2503 = vmatprep.subr.bf16.mxu1 %v2815_v16  ;;  %v2831_v32 = vld [vmem:[%s3121_s13 + $0xf0] sm:$0xff]   ;;  %v2835_v37 = vld [vmem:[%s3121_s13 + $0xf8] sm:$0xff]   ;;  %v2839_v44 = vld [vmem:[%s3121_s13 + $0x1c0] sm:$0xff]  }
  0x23   : > { %v2832_v33 = vld [vmem:[%s3121_s13 + $0x30] sm:$0xff]   ;;  %v2836_v39 = vld [vmem:[%s3121_s13 + $0x38] sm:$0xff]   ;;  %v2840_v46 = vld [vmem:[%s3121_s13 + $0x100] sm:$0xff]  }
  0x24   : > { %2476 = vmatpush3.bf16.msra.mxu0 %v2816_v17  ;;  %v2833_v34 = vld [vmem:[%s3121_s13 + $0xb0] sm:$0xff]   ;;  %v2837_v40 = vld [vmem:[%s3121_s13 + $0xb8] sm:$0xff]   ;;  %v2841_v48 = vld [vmem:[%s3121_s13 + $0x180] sm:$0xff]  }
  0x25   : > { %2504 = vmatpush3.bf16.msra.mxu1 %v2817_v18  ;;  %2477 = vmatprep.subr.bf16.mxu0 %v2818_v19  ;;  %v2842_v49 = vld [vmem:[%s3121_s13 + $0x148] sm:$0xff]   ;;  %v2846_v58 = vld [vmem:[%s3121_s13 + $0x150] sm:$0xff]   ;;  %v2850_v1 = vld [vmem:[%s3121_s13 + $0x158] sm:$0xff]  }
  0x26   : > { %2505 = vmatprep.subr.bf16.mxu1 %v2819_v20  ;;  %v2843_v52 = vld [vmem:[%s3121_s13 + $0x1c8] sm:$0xff]   ;;  %v2847_v60 = vld [vmem:[%s3121_s13 + $0x1d0] sm:$0xff]   ;;  %v2851_v2 = vld [vmem:[%s3121_s13 + $0x1d8] sm:$0xff]  }
  0x27   : > { %v2844_v55 = vld [vmem:[%s3121_s13 + $0x108] sm:$0xff]   ;;  %v2848_v62 = vld [vmem:[%s3121_s13 + $0x110] sm:$0xff]   ;;  %v2852_v3 = vld [vmem:[%s3121_s13 + $0x118] sm:$0xff]  }
  0x28   : > { %2478 = vmatpush3.bf16.msra.mxu0 %v2820_v21  ;;  %v2845_v56 = vld [vmem:[%s3121_s13 + $0x188] sm:$0xff]   ;;  %v2849_v0 = vld [vmem:[%s3121_s13 + $0x190] sm:$0xff]   ;;  %v2853_v4 = vld [vmem:[%s3121_s13 + $0x198] sm:$0xff]  }
  0x29   : > { %2506 = vmatpush3.bf16.msra.mxu1 %v2821_v22  ;;  %2479 = vmatprep.subr.bf16.mxu0 %v2822_v23  ;;  %v2854_v5 = vld [vmem:[%s3121_s13 + $0x160] sm:$0xff]   ;;  %v2858_v9 = vld [vmem:[%s3121_s13 + $0x168] sm:$0xff]   ;;  %v2866_v13 = vld [vmem:[%s3121_s13 + $0x170] sm:$0xff]   ;;  %v2299_v23 = vcombine.low %v3173_v50, %v3178_v51 }
  0x2a   : > { %2507 = vmatprep.subr.bf16.mxu1 %v2823_v24  ;;  %v2855_v6 = vld [vmem:[%s3121_s13 + $0x1e0] sm:$0xff]   ;;  %v2859_v10 = vld [vmem:[%s3121_s13 + $0x1e8] sm:$0xff]   ;;  %v2867_v14 = vld [vmem:[%s3121_s13 + $0x1f0] sm:$0xff]   ;;  %v2301_v24 = vcombine.low %v3184_v53, %v3189_v54 }
  0x2b   : > { %v2856_v7 = vld [vmem:[%s3121_s13 + $0x120] sm:$0xff]   ;;  %v2861_v11 = vld [vmem:[%s3121_s13 + $0x128] sm:$0xff]   ;;  %v2868_v15 = vld [vmem:[%s3121_s13 + $0x130] sm:$0xff]  }
  0x2c   : > { %2480 = vmatpush3.bf16.msra.mxu0 %v2824_v25  ;;  %v2857_v8 = vld [vmem:[%s3121_s13 + $0x1a0] sm:$0xff]   ;;  %v2862_v12 = vld [vmem:[%s3121_s13 + $0x1a8] sm:$0xff]   ;;  %v2869_v16 = vld [vmem:[%s3121_s13 + $0x1b0] sm:$0xff]  }
  0x2d   : > { %2508 = vmatpush3.bf16.msra.mxu1 %v2825_v26  ;;  %2481 = vmatprep.subr.bf16.mxu0 %v2826_v27  ;;  %v2870_v17 = vld [vmem:[%s3121_s13 + $0x178] sm:$0xff]   ;;  %v215_v18 = vld [vmem:[%s3669_s1 + $0x90] sm:$0xff]  ;;  %v2874_v25 = vld [vmem:[%s3121_s13 + $0x240] sm:$0xff]  }
  0x2e   : > { %2509 = vmatprep.subr.bf16.mxu1 %v2827_v28  ;;  %v2871_v19 = vld [vmem:[%s3121_s13 + $0x1f8] sm:$0xff]   ;;  %v2875_v26 = vld [vmem:[%s3121_s13 + $0x2c0] sm:$0xff]   ;;  %v2316_v27 = vcombine.high %v215_v18, %v215_v18  ;;  %v2881_v38 = vld [vmem:[%s3121_s13 + $0x288] sm:$0xff]  }
  0x2f   : > { %v216_v20 = vld [vmem:[%s3669_s1 + $0x98] sm:$0xff]  ;;  %v2876_v28 = vld [vmem:[%s3121_s13 + $0x200] sm:$0xff]  }
  0x30   : > { %2482 = vmatpush3.bf16.msra.mxu0 %v2828_v29  ;;  %v2872_v21 = vld [vmem:[%s3121_s13 + $0x138] sm:$0xff]   ;;  %v2318_v29 = vcombine.high %v216_v20, %v216_v20  ;;  %v2894_v51 = vld [vmem:[%s3121_s13 + $0x260] sm:$0xff]  }
  0x31   : > { %2510 = vmatpush3.bf16.msra.mxu1 %v2829_v30  ;;  %2483 = vmatprep.subr.bf16.mxu0 %v2830_v31  ;;  %v2873_v22 = vld [vmem:[%s3121_s13 + $0x1b8] sm:$0xff]   ;;  %v2877_v30 = vld [vmem:[%s3121_s13 + $0x280] sm:$0xff]   ;;  %v2878_v31 = vld [vmem:[%s3121_s13 + $0x248] sm:$0xff]  }
  0x32   : > { %2511 = vmatprep.subr.bf16.mxu1 %v2831_v32  ;;  %v3239_v32 = vld [vmem:[%s3669_s1 + $0x20] sm:$0xff]  ;;  %v2893_v50 = vld [vmem:[%s3121_s13 + $0x298] sm:$0xff]  }
  0x33   : > { %v2896_v53 = vld [vmem:[%s3121_s13 + $0x220] sm:$0xff]  }
  0x34   : > { %2484 = vmatpush3.bf16.msra.mxu0 %v2832_v33  ;;  %v3244_v33 = vld [vmem:[%s3669_s1 + $0x60] sm:$0xff] }
  0x35   : > { %2512 = vmatpush3.bf16.msra.mxu1 %v2833_v34  ;;  %2485 = vmatprep.subr.bf16.mxu0 %v2834_v35  ;;  %v2879_v34 = vld [vmem:[%s3121_s13 + $0x2c8] sm:$0xff]   ;;  %v2897_v54 = vld [vmem:[%s3121_s13 + $0x2a0] sm:$0xff]  }
  0x36   : > { %2513 = vmatprep.subr.bf16.mxu1 %v2835_v37  ;;  %v3250_v35 = vld [vmem:[%s3669_s1 + $0x28] sm:$0xff] }
  0x37   : > { %v2880_v37 = vld [vmem:[%s3121_s13 + $0x208] sm:$0xff]  }
  0x38   : > { %2486 = vmatpush3.bf16.msra.mxu0 %v2836_v39  ;;  %v2315_v39 = vcombine.low %v215_v18, %v215_v18  ;;  %v2920_v18 = vld [vmem:[%s3121_s13 + $0x350] sm:$0xff]  }
  0x39   : > { %2514 = vmatpush3.bf16.msra.mxu1 %v2837_v40  ;;  %2527 = vmatprep.subr.bf16.mxu0 %v2838_v43  ;;  %v2884_v40 = vld [vmem:[%s3121_s13 + $0x250] sm:$0xff]   ;;  %v2304_v43 = vcombine.high %v3239_v32, %v3244_v33 }
  0x3a   : > { %2555 = vmatprep.subr.bf16.mxu1 %v2839_v44  ;;  %v2887_v44 = vld [vmem:[%s3121_s13 + $0x210] sm:$0xff]  }
  0x3b   : > { %1432 = vmatmul.mubr.bf16.vlgmr.msra.gmra.mrb[0].mxu0 %v2295_v41  ;;  %v2317_v41 = vcombine.low %v216_v20, %v216_v20  ;;  %v2921_v20 = vld [vmem:[%s3121_s13 + $0x3d0] sm:$0xff]  }
  0x3c   : > { %1480 = vmatmul.mubr.bf16.vlgmr.msra.gmra.mrb[0].mxu1 %v2297_v42  ;;  %2528 = vmatpush3.bf16.msra.mxu0 %v2840_v46  ;;  %v2885_v42 = vld [vmem:[%s3121_s13 + $0x2d0] sm:$0xff]  }
  0x3d   : > { %2556 = vmatpush3.bf16.msra.mxu1 %v2841_v48  ;;  %1439 = vmatprep.mubr.bf16.mxu0 %v2312_v45  ;;  %v2306_v45 = vcombine.high %v3250_v35, %v3255_v36  ;;  %v2888_v46 = vld [vmem:[%s3121_s13 + $0x290] sm:$0xff]   ;;  %v2891_v48 = vld [vmem:[%s3121_s13 + $0x2d8] sm:$0xff]  }
  0x3e   : > { %2529 = vmatprep.subr.bf16.mxu0 %v2842_v49  ;;  %1487 = vmatprep.mubr.bf16.mxu1 %v2314_v47  ;;  %v2890_v47 = vld [vmem:[%s3121_s13 + $0x258] sm:$0xff]  }
  0x3f   : > { %2557 = vmatprep.subr.bf16.mxu1 %v2843_v52  ;;  %v2892_v49 = vld [vmem:[%s3121_s13 + $0x218] sm:$0xff]   ;;  %v2895_v52 = vld [vmem:[%s3121_s13 + $0x2e0] sm:$0xff]  }
  0x40   : > { %2530 = vmatpush3.bf16.msra.mxu0 %v2844_v55  ;;  %v2898_v55 = vld [vmem:[%s3121_s13 + $0x268] sm:$0xff]  }
  0x41   : > { %2558 = vmatpush3.bf16.msra.mxu1 %v2845_v56  ;;  %2531 = vmatprep.subr.bf16.mxu0 %v2846_v58  ;;  %v2899_v56 = vld [vmem:[%s3121_s13 + $0x2e8] sm:$0xff]  }
  0x42   : > { %2559 = vmatprep.subr.bf16.mxu1 %v2847_v60  ;;  %v2901_v58 = vld [vmem:[%s3121_s13 + $0x2a8] sm:$0xff]   ;;  %v2903_v60 = vld [vmem:[%s3121_s13 + $0x2f0] sm:$0xff]  }
  0x43   : > { %1440 = vmatmul.mubr.bf16.gmra.mrb[4].mxu0 %v2311_v57  ;;  %v2900_v57 = vld [vmem:[%s3121_s13 + $0x228] sm:$0xff]  }
  0x44   : > { %2532 = vmatpush3.bf16.msra.mxu0 %v2848_v62  ;;  %1488 = vmatmul.mubr.bf16.gmra.mrb[4].mxu1 %v2313_v59  ;;  %v2902_v59 = vld [vmem:[%s3121_s13 + $0x270] sm:$0xff]  }
  0x45   : > { %2560 = vmatpush3.bf16.msra.mxu1 %v2849_v0  ;;  %1527 = vmatprep.mubr.bf16.mxu0 %v2300_v61  ;;  %v2904_v61 = vld [vmem:[%s3121_s13 + $0x230] sm:$0xff]   ;;  %v217_v0 = vld [vmem:[%s3669_s1 + $0xa0] sm:$0xff] }
  0x46   : > { %2533 = vmatprep.subr.bf16.mxu0 %v2850_v1  ;;  %1575 = vmatprep.mubr.bf16.mxu1 %v2302_v63  ;;  %v2905_v62 = vld [vmem:[%s3121_s13 + $0x2b0] sm:$0xff]   ;;  %v2906_v63 = vld [vmem:[%s3121_s13 + $0x278] sm:$0xff]  }
  0x47   : > { %2561 = vmatprep.subr.bf16.mxu1 %v2851_v2  ;;  %v2907_v1 = vld [vmem:[%s3121_s13 + $0x2f8] sm:$0xff]   ;;  %v218_v2 = vld [vmem:[%s3669_s1 + $0xa8] sm:$0xff] }
  0x48   : > { %2534 = vmatpush3.bf16.msra.mxu0 %v2852_v3  ;;  %v2908_v3 = vld [vmem:[%s3121_s13 + $0x238] sm:$0xff]  }
  0x49   : > { %2562 = vmatpush3.bf16.msra.mxu1 %v2853_v4  ;;  %2535 = vmatprep.subr.bf16.mxu0 %v2854_v5  ;;  %v2909_v4 = vld [vmem:[%s3121_s13 + $0x2b8] sm:$0xff]   ;;  %v2303_v5 = vcombine.low %v3239_v32, %v3244_v33  ;;  %v2935_v32 = vld [vmem:[%s3121_s13 + $0x3e8] sm:$0xff]   ;;  %v477_v33 = vld [vmem:[%s3670_s2] sm:$0xff] }
  0x4a   : > { %2563 = vmatprep.subr.bf16.mxu1 %v2855_v6  ;;  %v2305_v6 = vcombine.low %v3250_v35, %v3255_v36  ;;  %482 = vperm.xlu0 %2804, %v477_v33   ;;  %v2937_v35 = vld [vmem:[%s3121_s13 + $0x3a8] sm:$0xff]   ;;  %v2938_v36 = vld [vmem:[%s3121_s13 + $0x370] sm:$0xff]  }
  0x4b   : > { %v1840_v33 = vld [vmem:[%s3671_s3 + $0x1c8] sm:$0xff] }
  0x4c   : > { %2536 = vmatpush3.bf16.msra.mxu0 %v2856_v7  ;;  %v2910_v7 = vld [vmem:[%s3121_s13 + $0x340] sm:$0xff]  }
  0x4d   : > { %2564 = vmatpush3.bf16.msra.mxu1 %v2857_v8  ;;  %2537 = vmatprep.subr.bf16.mxu0 %v2858_v9  ;;  %v2911_v8 = vld [vmem:[%s3121_s13 + $0x3c0] sm:$0xff]   ;;  %v2320_v9 = vcombine.high %v217_v0, %v217_v0 }
  0x4e   : > { %2565 = vmatprep.subr.bf16.mxu1 %v2859_v10  ;;  %v2912_v10 = vld [vmem:[%s3121_s13 + $0x300] sm:$0xff]  }
  0x50   : > { %2538 = vmatpush3.bf16.msra.mxu0 %v2861_v11  ;;  %v2322_v11 = vcombine.high %v218_v2, %v218_v2 }
  0x51   : > { %2566 = vmatpush3.bf16.msra.mxu1 %v2862_v12  ;;  %2539 = vmatprep.subr.bf16.mxu0 %v2866_v13  ;;  %v2913_v12 = vld [vmem:[%s3121_s13 + $0x380] sm:$0xff]   ;;  %v2914_v13 = vld [vmem:[%s3121_s13 + $0x348] sm:$0xff]  }
  0x52   : > { %2567 = vmatprep.subr.bf16.mxu1 %v2867_v14  ;;  %v2915_v14 = vld [vmem:[%s3121_s13 + $0x3c8] sm:$0xff]  }
  0x54   : > { %2540 = vmatpush3.bf16.msra.mxu0 %v2868_v15  ;;  %v2916_v15 = vld [vmem:[%s3121_s13 + $0x308] sm:$0xff]  }
  0x55   : > { %2568 = vmatpush3.bf16.msra.mxu1 %v2869_v16  ;;  %2541 = vmatprep.subr.bf16.mxu0 %v2870_v17  ;;  %v2917_v16 = vld [vmem:[%s3121_s13 + $0x388] sm:$0xff]   ;;  %v2319_v17 = vcombine.low %v217_v0, %v217_v0  ;;  %v1794_v0 = vld [vmem:[%s3671_s3 + $0x58] sm:$0xff] }
  0x56   : > { %2569 = vmatprep.subr.bf16.mxu1 %v2871_v19  ;;  %v2321_v19 = vcombine.low %v218_v2, %v218_v2  ;;  %v1791_v2 = vld [vmem:[%s3671_s3 + $0x40] sm:$0xff] }
  0x58   : > { %2542 = vmatpush3.bf16.msra.mxu0 %v2872_v21  ;;  %v2923_v21 = vld [vmem:[%s3121_s13 + $0x310] sm:$0xff]  }
  0x59   : > { %2570 = vmatpush3.bf16.msra.mxu1 %v2873_v22  ;;  %2583 = vmatprep.subr.bf16.mxu0 %v2874_v25  ;;  %v2924_v22 = vld [vmem:[%s3121_s13 + $0x390] sm:$0xff]   ;;  %v2928_v25 = vld [vmem:[%s3121_s13 + $0x318] sm:$0xff]  }
  0x5a   : > { %2611 = vmatprep.subr.bf16.mxu1 %v2875_v26  ;;  %v2929_v26 = vld [vmem:[%s3121_s13 + $0x398] sm:$0xff]  }
  0x5b   : > { %1528 = vmatmul.mubr.bf16.vlgmr.msra.gmra.mrb[8].mxu0 %v2299_v23  ;;  %v2926_v23 = vld [vmem:[%s3121_s13 + $0x358] sm:$0xff]  }
  0x5c   : > { %1576 = vmatmul.mubr.bf16.vlgmr.msra.gmra.mrb[8].mxu1 %v2301_v24  ;;  %2584 = vmatpush3.bf16.msra.mxu0 %v2876_v28  ;;  %v2927_v24 = vld [vmem:[%s3121_s13 + $0x3d8] sm:$0xff]   ;;  %v2931_v28 = vld [vmem:[%s3121_s13 + $0x3e0] sm:$0xff]  }
  0x5d   : > { %2612 = vmatpush3.bf16.msra.mxu1 %v2877_v30  ;;  %1535 = vmatprep.mubr.bf16.mxu0 %v2316_v27  ;;  %v2930_v27 = vld [vmem:[%s3121_s13 + $0x360] sm:$0xff]  }
  0x5e   : > { %2585 = vmatprep.subr.bf16.mxu0 %v2878_v31  ;;  %1583 = vmatprep.mubr.bf16.mxu1 %v2318_v29  ;;  %v2932_v29 = vld [vmem:[%s3121_s13 + $0x320] sm:$0xff]   ;;  %v2934_v31 = vld [vmem:[%s3121_s13 + $0x368] sm:$0xff]  }
  0x5f   : > { %2613 = vmatprep.subr.bf16.mxu1 %v2879_v34  ;;  %v2933_v30 = vld [vmem:[%s3121_s13 + $0x3a0] sm:$0xff]   ;;  %v2936_v34 = vld [vmem:[%s3121_s13 + $0x328] sm:$0xff]  }
  0x60   : > { %2586 = vmatpush3.bf16.msra.mxu0 %v2880_v37  ;;  %v2939_v37 = vld [vmem:[%s3121_s13 + $0x3f0] sm:$0xff]  }
  0x61   : > { %2614 = vmatpush3.bf16.msra.mxu1 %v2881_v38  ;;  %2587 = vmatprep.subr.bf16.mxu0 %v2884_v40  ;;  %v478_v38 = vld [vmem:[%s3670_s2 + $0x8] sm:$0xff]  ;;  %v2941_v40 = vld [vmem:[%s3121_s13 + $0x3b0] sm:$0xff]  }
  0x62   : > { %2615 = vmatprep.subr.bf16.mxu1 %v2885_v42  ;;  %487 = vperm.xlu0 %2804, %v478_v38   ;;  %v2943_v42 = vld [vmem:[%s3121_s13 + $0x3f8] sm:$0xff]   ;;  %v1839_v38 = vld [vmem:[%s3671_s3 + $0x1c0] sm:$0xff] }
  0x63   : > { %1536 = vmatmul.mubr.bf16.gmra.mrb[12].mxu0 %v2315_v39  ;;  %v2940_v39 = vld [vmem:[%s3121_s13 + $0x330] sm:$0xff]  }
  0x64   : > { %2588 = vmatpush3.bf16.msra.mxu0 %v2887_v44  ;;  %1584 = vmatmul.mubr.bf16.gmra.mrb[12].mxu1 %v2317_v41  ;;  %v2942_v41 = vld [vmem:[%s3121_s13 + $0x378] sm:$0xff]  }
  0x65   : > { %2616 = vmatpush3.bf16.msra.mxu1 %v2888_v46  ;;  %1623 = vmatprep.mubr.bf16.mxu0 %v2304_v43  ;;  %v2944_v43 = vld [vmem:[%s3121_s13 + $0x338] sm:$0xff]   ;;  %v211_v46 = vld [vmem:[%s3669_s1 + $0x70] sm:$0xff] }
  0x66   : > { %2589 = vmatprep.subr.bf16.mxu0 %v2890_v47  ;;  %1671 = vmatprep.mubr.bf16.mxu1 %v2306_v45  ;;  %v2945_v44 = vld [vmem:[%s3121_s13 + $0x3b8] sm:$0xff]   ;;  %v203_v45 = vld [vmem:[%s3669_s1 + $0x30] sm:$0xff]  ;;  %s3590_s13 = scalar_lea.vmem [#allocation2], %s2759_s30 }
  0x67   : > { %2617 = vmatprep.subr.bf16.mxu1 %v2891_v48  ;;  %v204_v47 = vld [vmem:[%s3669_s1 + $0x38] sm:$0xff]  ;;  %s2227_s6 = sshll.u32 %s3590_s13, 4  ;;  %s3619_s6 = int_to_ptr.vmem [resolvable:$true] %s2227_s6 }
  0x68   : > { %2590 = vmatpush3.bf16.msra.mxu0 %v2892_v49  ;;  %v212_v48 = vld [vmem:[%s3669_s1 + $0x78] sm:$0xff]  ;;  %v2307_v49 = vcombine.low %v203_v45, %v211_v46  ;;  %s2950_s10 = scalar_lea.vmem %s3619_s6, 3072  ;;  %p2957_p0 = scmp.lt.s32.totalorder %s3619_s6, %s2955_s12 }
  0x69   : > { %2618 = vmatpush3.bf16.msra.mxu1 %v2893_v50  ;;  %2591 = vmatprep.subr.bf16.mxu0 %v2894_v51  ;;  %v2308_v50 = vcombine.high %v203_v45, %v211_v46  ;;  %v2309_v51 = vcombine.low %v204_v47, %v212_v48  ;;  %v1796_v45 = vld [vmem:[%s3671_s3 + $0x68] sm:$0xff]  ;;  %v1790_v46 = vld [vmem:[%s3671_s3 + $0x38] sm:$0xff]  ;;  %p2951_p11 = scmp.ne.s32.totalorder %s3619_s6, %s2950_s10  ;;  %p2958_p1 = scmp.lt.s32.totalorder %s2956_s14, %s2950_s10 }
  0x6a   : > { %2619 = vmatprep.subr.bf16.mxu1 %v2895_v52  ;;  %v2310_v52 = vcombine.high %v204_v47, %v212_v48  ;;  %v1798_v48 = vld [vmem:[%s3671_s3 + $0x78] sm:$0xff] }
  0x6b   : > { %p2952_p12 = pnand %p2951_p11, %p3082_p5  ;;  %p2959_p2 = por %p2958_p1, %p2957_p0 }
  0x6c   : > { %2592 = vmatpush3.bf16.msra.mxu0 %v2896_v53  ;;  %v219_v53 = vld [vmem:[%s3669_s1 + $0xb0] sm:$0xff] }
  0x6d   : > { %2620 = vmatpush3.bf16.msra.mxu1 %v2897_v54  ;;  %2593 = vmatprep.subr.bf16.mxu0 %v2898_v55  ;;  %v220_v54 = vld [vmem:[%s3669_s1 + $0xb8] sm:$0xff]  ;;  %v479_v55 = vld [vmem:[%s3670_s2 + $0x10] sm:$0xff]  ;;  %p2953_p13 = pneg %p2952_p12 }
  0x6e   : > { %2621 = vmatprep.subr.bf16.mxu1 %v2899_v56  ;;  %v2324_v56 = vcombine.high %v219_v53, %v219_v53  ;;  %492 = vperm.xlu1 %2805, %v479_v55  }
  0x6f   : > { %p2960_p3 = pnand %p2959_p2, %p2953_p13 }
  0x70   : > { %2594 = vmatpush3.bf16.msra.mxu0 %v2900_v57  ;;  %v2326_v57 = vcombine.high %v220_v54, %v220_v54 }
  0x71   : > { %2622 = vmatpush3.bf16.msra.mxu1 %v2901_v58  ;;  %2595 = vmatprep.subr.bf16.mxu0 %v2902_v59  ;;  %v2323_v58 = vcombine.low %v219_v53, %v219_v53  ;;  %v2325_v59 = vcombine.low %v220_v54, %v220_v54 }
  0x72   : > { %2623 = vmatprep.subr.bf16.mxu1 %v2903_v60  ;;  %v1784_v60 = vld [vmem:[%s3671_s3 + $0x8] sm:$0xff] }
  0x74   : > { %2596 = vmatpush3.bf16.msra.mxu0 %v2904_v61  ;;  %v1792_v61 = vld [vmem:[%s3671_s3 + $0x48] sm:$0xff] }
  0x75   : > { %2624 = vmatpush3.bf16.msra.mxu1 %v2905_v62  ;;  %2597 = vmatprep.subr.bf16.mxu0 %v2906_v63  ;;  %v1786_v62 = vld [vmem:[%s3671_s3 + $0x18] sm:$0xff]  ;;  %v2695_v63 = vpack.c.bf16 %v1792_v61, %v1784_v60 }
  0x76   : > { %2625 = vmatprep.subr.bf16.mxu1 %v2907_v1  ;;  %v1783_v1 = vld [vmem:[%s3671_s3] sm:$0xff] }
  0x78   : > { %2598 = vmatpush3.bf16.msra.mxu0 %v2908_v3  ;;  %v2711_v3 = vpack.c.bf16 %v1794_v0, %v1786_v62 }
  0x79   : > { %2626 = vmatpush3.bf16.msra.mxu1 %v2909_v4  ;;  %2639 = vmatprep.subr.bf16.mxu0 %v2910_v7  ;;  %v2697_v4 = vpack.c.bf16 %v1791_v2, %v1783_v1  ;;  %v1800_v7 = vld [vmem:[%s3671_s3 + $0x88] sm:$0xff] }
  0x7a   : > { %2667 = vmatprep.subr.bf16.mxu1 %v2911_v8 }
  0x7b   : > { %1624 = vmatmul.mubr.bf16.vlgmr.msra.gmra.mrb[16].mxu0 %v2303_v5  ;;  %v1785_v5 = vld [vmem:[%s3671_s3 + $0x10] sm:$0xff] }
  0x7c   : > { %1672 = vmatmul.mubr.bf16.vlgmr.msra.gmra.mrb[16].mxu1 %v2305_v6  ;;  %2640 = vmatpush3.bf16.msra.mxu0 %v2912_v10  ;;  %v1793_v6 = vld [vmem:[%s3671_s3 + $0x50] sm:$0xff]  ;;  %v1802_v10 = vld [vmem:[%s3671_s3 + $0x98] sm:$0xff] }
  0x7d   : > { %2668 = vmatpush3.bf16.msra.mxu1 %v2913_v12  ;;  %1631 = vmatprep.mubr.bf16.mxu0 %v2320_v9  ;;  %v2713_v8 = vpack.c.bf16 %v1793_v6, %v1785_v5  ;;  %v1808_v9 = vld [vmem:[%s3671_s3 + $0xc8] sm:$0xff] }
  0x7e   : > { %2641 = vmatprep.subr.bf16.mxu0 %v2914_v13  ;;  %1679 = vmatprep.mubr.bf16.mxu1 %v2322_v11  ;;  %v1810_v11 = vld [vmem:[%s3671_s3 + $0xd8] sm:$0xff]  ;;  %v2699_v12 = vpack.c.bf16 %v1808_v9, %v1800_v7 }
  0x7f   : > { %2669 = vmatprep.subr.bf16.mxu1 %v2915_v14  ;;  %v2715_v13 = vpack.c.bf16 %v1810_v11, %v1802_v10  ;;  %v1799_v14 = vld [vmem:[%s3671_s3 + $0x80] sm:$0xff] }
  0x80   : > { %2642 = vmatpush3.bf16.msra.mxu0 %v2916_v15  ;;  %v1807_v15 = vld [vmem:[%s3671_s3 + $0xc0] sm:$0xff] }
  0x81   : > { %2670 = vmatpush3.bf16.msra.mxu1 %v2917_v16  ;;  %2643 = vmatprep.subr.bf16.mxu0 %v2920_v18  ;;  %v1801_v16 = vld [vmem:[%s3671_s3 + $0x90] sm:$0xff] }
  0x82   : > { %2671 = vmatprep.subr.bf16.mxu1 %v2921_v20  ;;  %v1809_v18 = vld [vmem:[%s3671_s3 + $0xd0] sm:$0xff]  ;;  %v1824_v20 = vld [vmem:[%s3671_s3 + $0x148] sm:$0xff] }
  0x83   : > { %1632 = vmatmul.mubr.bf16.gmra.mrb[20].mxu0 %v2319_v17  ;;  %v2701_v17 = vpack.c.bf16 %v1807_v15, %v1799_v14 }
  0x84   : > { %2644 = vmatpush3.bf16.msra.mxu0 %v2923_v21  ;;  %1680 = vmatmul.mubr.bf16.gmra.mrb[20].mxu1 %v2321_v19  ;;  %v1816_v19 = vld [vmem:[%s3671_s3 + $0x108] sm:$0xff]  ;;  %v2717_v21 = vpack.c.bf16 %v1809_v18, %v1801_v16 }
  0x85   : > { %2672 = vmatpush3.bf16.msra.mxu1 %v2924_v22  ;;  %2645 = vmatprep.subr.bf16.mxu0 %v2926_v23  ;;  %v2703_v22 = vpack.c.bf16 %v1824_v20, %v1816_v19  ;;  %v1818_v23 = vld [vmem:[%s3671_s3 + $0x118] sm:$0xff] }
  0x86   : > { %2673 = vmatprep.subr.bf16.mxu1 %v2927_v24  ;;  %1719 = vmatprep.mubr.bf16.mxu0 %v2308_v50  ;;  %v1826_v24 = vld [vmem:[%s3671_s3 + $0x158] sm:$0xff]  ;;  %v3015_v50 = vmov 0.0  }
  0x87   : > { %1767 = vmatprep.mubr.bf16.mxu1 %v2310_v52 }
  0x88   : > { %2646 = vmatpush3.bf16.msra.mxu0 %v2928_v25  ;;  %v2719_v25 = vpack.c.bf16 %v1826_v24, %v1818_v23 }
  0x89   : > { %2674 = vmatpush3.bf16.msra.mxu1 %v2929_v26  ;;  %2647 = vmatprep.subr.bf16.mxu0 %v2930_v27  ;;  %v1815_v26 = vld [vmem:[%s3671_s3 + $0x100] sm:$0xff] }
  0x8a   : > { %2675 = vmatprep.subr.bf16.mxu1 %v2931_v28  ;;  %v1823_v27 = vld [vmem:[%s3671_s3 + $0x140] sm:$0xff]  ;;  %v1817_v28 = vld [vmem:[%s3671_s3 + $0x110] sm:$0xff] }
  0x8c   : > { %2648 = vmatpush3.bf16.msra.mxu0 %v2932_v29  ;;  %v2705_v29 = vpack.c.bf16 %v1823_v27, %v1815_v26 }
  0x8d   : > { %2676 = vmatpush3.bf16.msra.mxu1 %v2933_v30  ;;  %2649 = vmatprep.subr.bf16.mxu0 %v2934_v31  ;;  %v1825_v30 = vld [vmem:[%s3671_s3 + $0x150] sm:$0xff] }
  0x8e   : > { %2677 = vmatprep.subr.bf16.mxu1 %v2935_v32  ;;  %v2721_v31 = vpack.c.bf16 %v1825_v30, %v1817_v28  ;;  %v1832_v32 = vld [vmem:[%s3671_s3 + $0x188] sm:$0xff] }
  0x90   : > { %2650 = vmatpush3.bf16.msra.mxu0 %v2936_v34  ;;  %v1834_v34 = vld [vmem:[%s3671_s3 + $0x198] sm:$0xff] }
  0x91   : > { %2678 = vmatpush3.bf16.msra.mxu1 %v2937_v35  ;;  %2651 = vmatprep.subr.bf16.mxu0 %v2938_v36  ;;  %v2707_v35 = vpack.c.bf16 %v1840_v33, %v1832_v32  ;;  %v1842_v36 = vld [vmem:[%s3671_s3 + $0x1d8] sm:$0xff] }
  0x92   : > { %2679 = vmatprep.subr.bf16.mxu1 %v2939_v37  ;;  %v1831_v37 = vld [vmem:[%s3671_s3 + $0x180] sm:$0xff] }
  0x94   : > { %2652 = vmatpush3.bf16.msra.mxu0 %v2940_v39  ;;  %v2723_v39 = vpack.c.bf16 %v1842_v36, %v1834_v34 }
  0x95   : > { %2680 = vmatpush3.bf16.msra.mxu1 %v2941_v40  ;;  %2653 = vmatprep.subr.bf16.mxu0 %v2942_v41  ;;  %v2709_v40 = vpack.c.bf16 %v1839_v38, %v1831_v37  ;;  %v1833_v41 = vld [vmem:[%s3671_s3 + $0x190] sm:$0xff] }
  0x96   : > { %2681 = vmatprep.subr.bf16.mxu1 %v2943_v42  ;;  %v1841_v42 = vld [vmem:[%s3671_s3 + $0x1d0] sm:$0xff] }
  0x98   : > { %2654 = vmatpush3.bf16.msra.mxu0 %v2944_v43  ;;  %v2725_v43 = vpack.c.bf16 %v1841_v42, %v1833_v41 }
  0x99   : > { %2682 = vmatpush3.bf16.msra.mxu1 %v2945_v44  ;;  %2696 = vmatprep.subr.bf16.mxu0 %v2695_v63  ;;  %v1788_v44 = vld [vmem:[%s3671_s3 + $0x28] sm:$0xff] }
  0x9a   : > { %2712 = vmatprep.subr.bf16.mxu1 %v2711_v3  ;;  %v2727_v47 = vpack.c.bf16 %v1796_v45, %v1788_v44 }
  0x9b   : > { %1720 = vmatmul.mubr.bf16.vlgmr.msra.gmra.mrb[24].mxu0 %v2307_v49  ;;  %v2743_v49 = vpack.c.bf16 %v1798_v48, %v1790_v46 }
  0x9c   : > { %1768 = vmatmul.mubr.bf16.vlgmr.msra.gmra.mrb[24].mxu1 %v2309_v51  ;;  %1727 = vmatprep.mubr.bf16.mxu0 %v2324_v56 }
  0x9d   : > { %1775 = vmatprep.mubr.bf16.mxu1 %v2326_v57  ;;  %2698 = vmatpush1.bf16.msra.mxu0 %v2697_v4 }
  0x9e   : > { %2714 = vmatpush1.bf16.msra.mxu1 %v2713_v8  ;;  %2700 = vmatprep.subr.bf16.mxu0 %v2699_v12 }
  0x9f   : > { %2716 = vmatprep.subr.bf16.mxu1 %v2715_v13 }
  0xa1   : > { %2702 = vmatpush1.bf16.msra.mxu0 %v2701_v17 }
  0xa2   : > { %2718 = vmatpush1.bf16.msra.mxu1 %v2717_v21  ;;  %2704 = vmatprep.subr.bf16.mxu0 %v2703_v22 }
  0xa3   : > { %1728 = vmatmul.mubr.bf16.gmra.mrb[28].mxu0 %v2323_v58  ;;  %2720 = vmatprep.subr.bf16.mxu1 %v2719_v25 }
  0xa4   : > { %1776 = vmatmul.mubr.bf16.gmra.mrb[28].mxu1 %v2325_v59  ;;  %1921 = vmatprep.mubr.f32.mxu0 %v3015_v50 }
  0xa5   : > { %2706 = vmatpush1.bf16.msra.mxu0 %v2705_v29  ;;  %2004 = vmatprep.mubr.f32.mxu1 %v3015_v50 }
  0xa6   : > { %2722 = vmatpush1.bf16.msra.mxu1 %v2721_v31  ;;  %2708 = vmatprep.subr.bf16.mxu0 %v2707_v35 }
  0xa7   : > { %2724 = vmatprep.subr.bf16.mxu1 %v2723_v39 }
  0xa9   : > { %2710 = vmatpush1.bf16.msra.mxu0 %v2709_v40 }
  0xaa   : > { %2726 = vmatpush1.bf16.msra.mxu1 %v2725_v43  ;;  %2728 = vmatprep.subr.bf16.mxu0 %v2727_v47 }
  0xab   : > { %2744 = vmatprep.subr.bf16.mxu1 %v2743_v49 }
  0xc9   : > { %v483_v52 = vpop.permute.xlu0 %482 }
  0xe1   : > { %v488_v0 = vpop.permute.xlu0 %487 }
  0xed   : > { %v493_v14 = vpop.permute.xlu1 %492 }
 0x10e   : > { %v2487_v51 = vpop.f32.mrb[0].mxu0 }
 0x10f   : > { %v2515_v53 = vpop.f32.mrb[0].mxu1  ;;  %v2488_v54 = vpop.f32.mrb[1].mxu0 }
 0x110   : > { %v2489_v55 = vadd.f32 %v2488_v54, %v2487_v51  ;;  %v2516_v56 = vpop.f32.mrb[1].mxu1  ;;  %v2490_v57 = vpop.f32.mrb[2].mxu0 }
 0x111   : > { %v2517_v58 = vadd.f32 %v2516_v56, %v2515_v53  ;;  %v2518_v59 = vpop.f32.mrb[2].mxu1  ;;  %v2491_v60 = vpop.f32.mrb[3].mxu0 }
 0x112   : > { %v1434_v61 = vadd.f32 %v2489_v55, %v483_v52  ;;  %v2492_v62 = vadd.f32 %v2491_v60, %v2490_v57  ;;  %v2519_v63 = vpop.f32.mrb[3].mxu1 }
 0x113   : > { %v2520_v1 = vadd.f32 %v2519_v63, %v2518_v59 }
 0x114   : > { %v1482_v2 = vadd.f32 %v2517_v58, %v1434_v61  ;;  %v1437_v3 = vadd.f32 %v2492_v62, %v488_v0 }
 0x116   : > { %v1485_v4 = vadd.f32 %v2520_v1, %v1437_v3  ;;  %v2493_v5 = vpop.f32.mrb[4].mxu0 }
 0x117   : > { %v2494_v6 = vpop.f32.mrb[5].mxu0  ;;  %v2521_v7 = vpop.f32.mrb[4].mxu1 }
 0x118   : > { %v2495_v8 = vadd.f32 %v2494_v6, %v2493_v5  ;;  %v2496_v9 = vpop.f32.mrb[6].mxu0  ;;  %v2522_v10 = vpop.f32.mrb[5].mxu1 }
 0x119   : > { %v2497_v11 = vpop.f32.mrb[7].mxu0  ;;  %v2523_v12 = vadd.f32 %v2522_v10, %v2521_v7  ;;  %v2524_v13 = vpop.f32.mrb[6].mxu1 }
 0x11a   : > { %v2525_v15 = vpop.f32.mrb[7].mxu1  ;;  %v1442_v16 = vadd.f32 %v2495_v8, %v493_v14 }
 0x11b   : > { %v1787_v15 = vld [vmem:[%s3671_s3 + $0x20] sm:$0xff] }
 0x11c   : > { %v1490_v17 = vadd.f32 %v2523_v12, %v1442_v16 }
 0x12e   : > { %v2543_v18 = vpop.f32.mrb[8].mxu0 }
 0x12f   : > { %v2571_v19 = vpop.f32.mrb[8].mxu1  ;;  %v2544_v20 = vpop.f32.mrb[9].mxu0 }
 0x130   : > { %v2545_v21 = vadd.f32 %v2544_v20, %v2543_v18  ;;  %v2572_v22 = vpop.f32.mrb[9].mxu1  ;;  %v2546_v23 = vpop.f32.mrb[10].mxu0  ;;  %v1795_v20 = vld [vmem:[%s3671_s3 + $0x60] sm:$0xff] }
 0x131   : > { %v2573_v24 = vadd.f32 %v2572_v22, %v2571_v19  ;;  %v2574_v25 = vpop.f32.mrb[10].mxu1  ;;  %v2547_v26 = vpop.f32.mrb[11].mxu0  ;;  %v1797_v22 = vld [vmem:[%s3671_s3 + $0x70] sm:$0xff] }
 0x132   : > { %v1530_v27 = vadd.f32 %v2545_v21, %v1482_v2  ;;  %v2548_v28 = vadd.f32 %v2547_v26, %v2546_v23  ;;  %v2575_v29 = vpop.f32.mrb[11].mxu1  ;;  %v1789_v21 = vld [vmem:[%s3671_s3 + $0x30] sm:$0xff] }
 0x133   : > { %v2576_v30 = vadd.f32 %v2575_v29, %v2574_v25  ;;  %v1804_v25 = vld [vmem:[%s3671_s3 + $0xa8] sm:$0xff] }
 0x134   : > { %v1578_v31 = vadd.f32 %v2573_v24, %v1530_v27  ;;  %v1533_v32 = vadd.f32 %v2548_v28, %v1485_v4  ;;  %v1812_v29 = vld [vmem:[%s3671_s3 + $0xe8] sm:$0xff] }
 0x136   : > { %v1581_v33 = vadd.f32 %v2576_v30, %v1533_v32  ;;  %v2549_v34 = vpop.f32.mrb[12].mxu0  ;;  %v1806_v30 = vld [vmem:[%s3671_s3 + $0xb8] sm:$0xff]  ;;  %v2729_v32 = vpack.c.bf16 %v1795_v20, %v1787_v15  ;;  %v1845_v15 = vld [vmem:[%s3671_s3 + $0x1f0] sm:$0xff] }
 0x137   : > { %v2550_v35 = vpop.f32.mrb[13].mxu0  ;;  %v2577_v36 = vpop.f32.mrb[12].mxu1 }
 0x138   : > { %v2551_v37 = vadd.f32 %v2550_v35, %v2549_v34  ;;  %v2578_v38 = vpop.f32.mrb[13].mxu1  ;;  %v2552_v39 = vpop.f32.mrb[14].mxu0  ;;  %v1803_v34 = vld [vmem:[%s3671_s3 + $0xa0] sm:$0xff] }
 0x139   : > { %v2579_v40 = vadd.f32 %v2578_v38, %v2577_v36  ;;  %v2553_v41 = vpop.f32.mrb[15].mxu0  ;;  %v2580_v42 = vpop.f32.mrb[14].mxu1  ;;  %v1805_v38 = vld [vmem:[%s3671_s3 + $0xb0] sm:$0xff] }
 0x13a   : > { %v1538_v43 = vadd.f32 %v2551_v37, %v1490_v17  ;;  %v2581_v44 = vpop.f32.mrb[15].mxu1  ;;  %v1811_v37 = vld [vmem:[%s3671_s3 + $0xe0] sm:$0xff]  ;;  %v1813_v39 = vld [vmem:[%s3671_s3 + $0xf0] sm:$0xff]  ;;  %v1820_v42 = vld [vmem:[%s3671_s3 + $0x128] sm:$0xff] }
 0x13c   : > { %v1586_v45 = vadd.f32 %v2579_v40, %v1538_v43  ;;  %v2731_v40 = vpack.c.bf16 %v1812_v29, %v1804_v25 }
 0x14e   : > { %v2599_v46 = vpop.f32.mrb[16].mxu0 }
 0x14f   : > { %v2627_v47 = vpop.f32.mrb[16].mxu1  ;;  %v2600_v48 = vpop.f32.mrb[17].mxu0 }
 0x150   : > { %v2601_v49 = vadd.f32 %v2600_v48, %v2599_v46  ;;  %v2628_v51 = vpop.f32.mrb[17].mxu1  ;;  %v2602_v52 = vpop.f32.mrb[18].mxu0  ;;  %v1828_v46 = vld [vmem:[%s3671_s3 + $0x168] sm:$0xff]  ;;  %v1830_v48 = vld [vmem:[%s3671_s3 + $0x178] sm:$0xff] }
 0x151   : > { %v2629_v53 = vadd.f32 %v2628_v51, %v2627_v47  ;;  %v2630_v54 = vpop.f32.mrb[18].mxu1  ;;  %v2603_v55 = vpop.f32.mrb[19].mxu0  ;;  %v1822_v47 = vld [vmem:[%s3671_s3 + $0x138] sm:$0xff] }
 0x152   : > { %v1626_v56 = vadd.f32 %v2601_v49, %v1578_v31  ;;  %v2604_v57 = vadd.f32 %v2603_v55, %v2602_v52  ;;  %v2631_v58 = vpop.f32.mrb[19].mxu1  ;;  %v1814_v31 = vld [vmem:[%s3671_s3 + $0xf8] sm:$0xff]  ;;  %v2733_v52 = vpack.c.bf16 %v1811_v37, %v1803_v34  ;;  %v1827_v55 = vld [vmem:[%s3671_s3 + $0x160] sm:$0xff] }
 0x153   : > { %v2632_v59 = vadd.f32 %v2631_v58, %v2630_v54  ;;  %v2747_v41 = vpack.c.bf16 %v1814_v31, %v1806_v30  ;;  %v1819_v54 = vld [vmem:[%s3671_s3 + $0x120] sm:$0xff] }
 0x154   : > { %v1674_v60 = vadd.f32 %v2629_v53, %v1626_v56  ;;  %v1629_v61 = vadd.f32 %v2604_v57, %v1581_v33  ;;  %v2745_v33 = vpack.c.bf16 %v1797_v22, %v1789_v21  ;;  %v2749_v53 = vpack.c.bf16 %v1813_v39, %v1805_v38 }
 0x156   : > { %v1677_v62 = vadd.f32 %v2632_v59, %v1629_v61  ;;  %v2605_v63 = vpop.f32.mrb[20].mxu0  ;;  %v1829_v61 = vld [vmem:[%s3671_s3 + $0x170] sm:$0xff] }
 0x157   : > { %v2606_v0 = vpop.f32.mrb[21].mxu0  ;;  %v2633_v1 = vpop.f32.mrb[20].mxu1 }
 0x158   : > { %v2607_v2 = vadd.f32 %v2606_v0, %v2605_v63  ;;  %v2634_v3 = vpop.f32.mrb[21].mxu1  ;;  %v2608_v4 = vpop.f32.mrb[22].mxu0 }
 0x159   : > { %v2635_v5 = vadd.f32 %v2634_v3, %v2633_v1  ;;  %v2609_v6 = vpop.f32.mrb[23].mxu0  ;;  %v2636_v7 = vpop.f32.mrb[22].mxu1  ;;  %v2735_v1 = vpack.c.bf16 %v1828_v46, %v1820_v42  ;;  %v1844_v3 = vld [vmem:[%s3671_s3 + $0x1e8] sm:$0xff]  ;;  %v1838_v4 = vld [vmem:[%s3671_s3 + $0x1b8] sm:$0xff] }
 0x15a   : > { %v1634_v8 = vadd.f32 %v2607_v2, %v1586_v45  ;;  %v2637_v9 = vpop.f32.mrb[23].mxu1  ;;  %v2751_v2 = vpack.c.bf16 %v1830_v48, %v1822_v47  ;;  %v2737_v7 = vpack.c.bf16 %v1827_v55, %v1819_v54 }
 0x15b   : > { %v1835_v9 = vld [vmem:[%s3671_s3 + $0x1a0] sm:$0xff] }
 0x15c   : > { %v3466_v10 = vadd.f32 %v2635_v5, %v1634_v8  ;;  %v1846_v5 = vld [vmem:[%s3671_s3 + $0x1f8] sm:$0xff] }
 0x16e   : > { %v2655_v11 = vpop.f32.mrb[24].mxu0 }
 0x16f   : > { %v2683_v12 = vpop.f32.mrb[24].mxu1  ;;  %v2656_v13 = vpop.f32.mrb[25].mxu0 }
 0x170   : > { %v2684_v14 = vpop.f32.mrb[25].mxu1  ;;  %v2657_v16 = vadd.f32 %v2656_v13, %v2655_v11  ;;  %v2658_v18 = vpop.f32.mrb[26].mxu0  ;;  %v1843_v13 = vld [vmem:[%s3671_s3 + $0x1e0] sm:$0xff] }
 0x171   : > { %v2685_v17 = vadd.f32 %v2684_v14, %v2683_v12  ;;  %v2686_v19 = vpop.f32.mrb[26].mxu1  ;;  %v2659_v23 = vpop.f32.mrb[27].mxu0  ;;  %v2755_v12 = vpack.c.bf16 %v1846_v5, %v1838_v4  ;;  %v1837_v14 = vld [vmem:[%s3671_s3 + $0x1b0] sm:$0xff] }
 0x172   : > { %v2687_v24 = vpop.f32.mrb[27].mxu1  ;;  %v1722_v26 = vadd.f32 %v2657_v16, %v1674_v60  ;;  %v2660_v27 = vadd.f32 %v2659_v23, %v2658_v18  ;;  %v1821_v60 = vld [vmem:[%s3671_s3 + $0x130] sm:$0xff]  ;;  %v2741_v16 = vpack.c.bf16 %v1843_v13, %v1835_v9 }
 0x173   : > { %v2688_v28 = vadd.f32 %v2687_v24, %v2686_v19  ;;  %v2753_v8 = vpack.c.bf16 %v1829_v61, %v1821_v60 }
 0x174   : > { %v3495_v35 = vadd.f32 %v2685_v17, %v1722_v26  ;;  %v1725_v36 = vadd.f32 %v2660_v27, %v1677_v62  ;;  %v1836_v62 = vld [vmem:[%s3671_s3 + $0x1a8] sm:$0xff]  ;;  %v2757_v17 = vpack.c.bf16 %v1845_v15, %v1837_v14 }
 0x176   : > { %v3509_v43 = vadd.f32 %v2688_v28, %v1725_v36  ;;  %v2661_v44 = vpop.f32.mrb[28].mxu0  ;;  %2455 = vmatmul.mubr.msk.f32.vlgmr.msra.gmra.mrb[32].mxu0 %vm1847_vm0, %v3495_v35  ;;  %2458 = vmatmul.mubr.msk.f32.vlgmr.msra.gmra.mrb[32].mxu1 %vm1847_vm0, %v3495_v35 }
 0x177   : > { %v2689_v45 = vpop.f32.mrb[28].mxu1  ;;  %2730 = vmatpush1.bf16.msra.mxu0 %v2729_v32  ;;  %2746 = vmatpush1.bf16.msra.mxu1 %v2745_v33  ;;  %v2662_v49 = vpop.f32.mrb[29].mxu0 }
 0x178   : > { %v2690_v51 = vpop.f32.mrb[29].mxu1  ;;  %v2663_v56 = vadd.f32 %v2662_v49, %v2661_v44  ;;  %v2664_v57 = vpop.f32.mrb[30].mxu0  ;;  %1927 = vmatprep.mubr.f32.mxu0 %v3015_v50  ;;  %2010 = vmatprep.mubr.f32.mxu1 %v3015_v50 }
 0x179   : > { %v2691_v58 = vadd.f32 %v2690_v51, %v2689_v45  ;;  %v2692_v59 = vpop.f32.mrb[30].mxu1  ;;  %v2665_v63 = vpop.f32.mrb[31].mxu0  ;;  %2732 = vmatprep.subr.bf16.mxu0 %v2731_v40  ;;  %2748 = vmatprep.subr.bf16.mxu1 %v2747_v41 }
 0x17a   : > { %v2693_v0 = vpop.f32.mrb[31].mxu1  ;;  %v1730_v6 = vadd.f32 %v2663_v56, %v3466_v10  ;;  %2456 = vmatmul.mubr.msk.f32.gmra.mrb[34].mxu0 %vm1847_vm0, %v3509_v43  ;;  %2459 = vmatmul.mubr.msk.f32.gmra.mrb[34].mxu1 %vm1847_vm0, %v3509_v43  ;;  %v2739_v10 = vpack.c.bf16 %v1844_v3, %v1836_v62 }
 0x17b   : > { %2734 = vmatpush1.bf16.msra.mxu0 %v2733_v52  ;;  %2750 = vmatpush1.bf16.msra.mxu1 %v2749_v53 }
 0x17c   : > { %v1778_v11 = vadd.f32 %v2691_v58, %v1730_v6  ;;  %1933 = vmatprep.mubr.f32.mxu0 %v3015_v50  ;;  %2016 = vmatprep.mubr.f32.mxu1 %v3015_v50 }
 0x17d   : > { %2736 = vmatprep.subr.bf16.mxu0 %v2735_v1  ;;  %2752 = vmatprep.subr.bf16.mxu1 %v2751_v2 }
 0x17e   : > { %2457 = vmatmul.mubr.msk.f32.gmra.mrb[36].mxu0 %vm1847_vm0, %v1778_v11  ;;  %2460 = vmatmul.mubr.msk.f32.gmra.mrb[36].mxu1 %vm1847_vm0, %v1778_v11 }
 0x17f   : > { %2738 = vmatpush1.bf16.msra.mxu0 %v2737_v7  ;;  %2754 = vmatpush1.bf16.msra.mxu1 %v2753_v8 }
 0x180   : > { %2740 = vmatprep.subr.bf16.mxu0 %v2739_v10  ;;  %2756 = vmatprep.subr.bf16.mxu1 %v2755_v12 }
 0x181   : > { %2087 = vmatprep.mubr.f32.mxu0 %v3015_v50  ;;  %2170 = vmatprep.mubr.f32.mxu1 %v3015_v50 }
 0x183   : > { %2742 = vmatpush1.bf16.msra.mxu0 %v2741_v16  ;;  %2758 = vmatpush1.bf16.msra.mxu1 %v2757_v17 }
 0x186   : > { %2461 = vmatmul.mubr.msk.f32.vlgmr.msra.gmra.mrb[38].mxu0 %vm1847_vm0, %v3495_v35  ;;  %2464 = vmatmul.mubr.msk.f32.vlgmr.msra.gmra.mrb[38].mxu1 %vm1847_vm0, %v3495_v35 }
 0x187   : > { %2093 = vmatprep.mubr.f32.mxu0 %v3015_v50  ;;  %2176 = vmatprep.mubr.f32.mxu1 %v3015_v50 }
 0x18a   : > { %2462 = vmatmul.mubr.msk.f32.gmra.mrb[40].mxu0 %vm1847_vm0, %v3509_v43  ;;  %2465 = vmatmul.mubr.msk.f32.gmra.mrb[40].mxu1 %vm1847_vm0, %v3509_v43 }
 0x18b   : > { %2099 = vmatprep.mubr.f32.mxu0 %v3015_v50  ;;  %2182 = vmatprep.mubr.f32.mxu1 %v3015_v50 }
 0x18e   : > { %2463 = vmatmul.mubr.msk.f32.gmra.mrb[42].mxu0 %vm1847_vm0, %v1778_v11  ;;  %2466 = vmatmul.mubr.msk.f32.gmra.mrb[42].mxu1 %vm1847_vm0, %v1778_v11 }
 0x249   : > { %v1923_v18 = vpop.f32.mrb[32].mxu0  ;;  %v2006_v19 = vpop.f32.mrb[32].mxu1 }
 0x24a   : > { %2189 = vst [vmem:[%s3590_s13] sm:$0xff] %v1923_v18  ;;  %2191 = vst [vmem:[%s3590_s13 + $0x10] sm:$0xff] %v2006_v19  ;;  %v1925_v50 = vpop.f32.mrb[33].mxu0  ;;  %v2008_v20 = vpop.f32.mrb[33].mxu1 }
 0x24b   : > { %2190 = vst [vmem:[%s3590_s13 + $0x8] sm:$0xff] %v1925_v50  ;;  %2192 = vst [vmem:[%s3590_s13 + $0x18] sm:$0xff] %v2008_v20 }
 0x24d   : > { %v1929_v21 = vpop.f32.mrb[34].mxu0  ;;  %v2012_v22 = vpop.f32.mrb[34].mxu1 }
 0x24e   : > { %2197 = vst [vmem:[%s3590_s13 + $0x40] sm:$0xff] %v1929_v21  ;;  %2199 = vst [vmem:[%s3590_s13 + $0x50] sm:$0xff] %v2012_v22  ;;  %v1931_v23 = vpop.f32.mrb[35].mxu0  ;;  %v2014_v24 = vpop.f32.mrb[35].mxu1 }
 0x24f   : > { %2198 = vst [vmem:[%s3590_s13 + $0x48] sm:$0xff] %v1931_v23  ;;  %2200 = vst [vmem:[%s3590_s13 + $0x58] sm:$0xff] %v2014_v24 }
 0x251   : > { %v1935_v25 = vpop.f32.mrb[36].mxu0  ;;  %v2018_v26 = vpop.f32.mrb[36].mxu1 }
 0x252   : > { %2205 = vst [vmem:[%s3590_s13 + $0x80] sm:$0xff] %v1935_v25  ;;  %2207 = vst [vmem:[%s3590_s13 + $0x90] sm:$0xff] %v2018_v26  ;;  %v1937_v27 = vpop.f32.mrb[37].mxu0  ;;  %v2020_v28 = vpop.f32.mrb[37].mxu1 }
 0x253   : > { %2206 = vst [vmem:[%s3590_s13 + $0x88] sm:$0xff] %v1937_v27  ;;  %2208 = vst [vmem:[%s3590_s13 + $0x98] sm:$0xff] %v2020_v28 }
 0x259   : > { %v2089_v29 = vpop.f32.mrb[38].mxu0  ;;  %v2172_v30 = vpop.f32.mrb[38].mxu1 }
 0x25a   : > { %2193 = vst [vmem:[%s3590_s13 + $0x20] sm:$0xff] %v2089_v29  ;;  %2195 = vst [vmem:[%s3590_s13 + $0x30] sm:$0xff] %v2172_v30  ;;  %v2091_v31 = vpop.f32.mrb[39].mxu0  ;;  %v2174_v32 = vpop.f32.mrb[39].mxu1 }
 0x25b   : > { %2194 = vst [vmem:[%s3590_s13 + $0x28] sm:$0xff] %v2091_v31  ;;  %2196 = vst [vmem:[%s3590_s13 + $0x38] sm:$0xff] %v2174_v32 }
 0x25d   : > { %v2095_v33 = vpop.f32.mrb[40].mxu0  ;;  %v2178_v34 = vpop.f32.mrb[40].mxu1 }
 0x25e   : > { %2201 = vst [vmem:[%s3590_s13 + $0x60] sm:$0xff] %v2095_v33  ;;  %2203 = vst [vmem:[%s3590_s13 + $0x70] sm:$0xff] %v2178_v34  ;;  %v2097_v35 = vpop.f32.mrb[41].mxu0  ;;  %v2180_v36 = vpop.f32.mrb[41].mxu1 }
 0x25f   : > { %2202 = vst [vmem:[%s3590_s13 + $0x68] sm:$0xff] %v2097_v35  ;;  %2204 = vst [vmem:[%s3590_s13 + $0x78] sm:$0xff] %v2180_v36 }
 0x261   : > { %v2101_v37 = vpop.f32.mrb[42].mxu0  ;;  %v2184_v38 = vpop.f32.mrb[42].mxu1 }
 0x262   : > { %2209 = vst [vmem:[%s3590_s13 + $0xa0] sm:$0xff] %v2101_v37  ;;  %2211 = vst [vmem:[%s3590_s13 + $0xb0] sm:$0xff] %v2184_v38  ;;  %v2103_v39 = vpop.f32.mrb[43].mxu0  ;;  %v2186_v40 = vpop.f32.mrb[43].mxu1 }
 0x263   : > { %2210 = vst [vmem:[%s3590_s13 + $0xa8] sm:$0xff] %v2103_v39  ;;  %2212 = vst [vmem:[%s3590_s13 + $0xb8] sm:$0xff] %v2186_v40 }
 0x264   : > { %2963 = shalt.err (!%p2960_p3)
}
 0x265   : > { %s2964_s20 = scalar_lea.hbm %s3617_s9, 3072  ;;  %s2968_s27 = scalar_lea.hbm %s3672_s4, 6144 }
 0x266   : > { %p2965_p4 = scmp.ne.s32.totalorder %s3617_s9, %s2964_s20  ;;  %p2969_p9 = scmp.lt.u32.totalorder %s3617_s9, %s3672_s4 }
 0x267   : > { %p2970_p10 = scmp.lt.u32.totalorder %s2968_s27, %s2964_s20  ;;  %p2972_p12 = scmp.lt.u32.totalorder %s2964_s20, %s3617_s9 }
 0x268   : > { %p2966_p7 = pnand %p2965_p4, %p3082_p5 }
 0x269   : > { %p2971_p11 = por %p2970_p10, %p2969_p9 }
 0x26a   : > { %p2967_p8 = pneg %p2966_p7 }
 0x26b   : > { %p2973_p13 = por %p2972_p12, %p2971_p11 }
 0x26d   : > { %p2974_p0 = pnand %p2973_p13, %p2967_p8 }
 0x26f   : > { %2977 = shalt.err (!%p2974_p0)
}
 0x270   : > { %s3017_s30 = smov 1024   ;;  %s3018_s13 = smov 64  }
 0x271   : > { %2761 = dma.vmem_to_hbm [thread:$0]  (%p3082_p5), %s3619_s6, 3072, %s3617_s9, %s3627_s19, %s3017_s30, %s3017_s30, %s3018_s13  }
 0x272 PF: > { %p2767_p1 = scmp.ge.s32.totalorder %s3012_s18, 2  ;;  %s2242_s5 = sand.u32 1, %s3000_s15  }
 0x273   : > { %s2243_s7 = scalar_lea.sflag [#allocation3], %s2242_s5 }
 0x274   : > { %p2764_p2 = pnand %p2767_p1, %p3086_p6 }
 0x276   : > { %2995 = dma.done.wait (!%p2764_p2), %s2243_s7, 3072  }
 0x277   : > { %2997 = vsyncadd (!%p2764_p2), %s2243_s7, 4294964224  ;;  %p14_p3 = scmp.ge.s32.totalorder %s3069_s21, 4   ;;  %s3675_s15 = smov %s3004_s16 }
 0x278   : > { %s3676_s16 = smov %s3008_s17  ;;  %s3677_s17 = smov %s3080_s24 }
 0x279   : > { %s3678_s18 = smov %s3069_s21  ;;  %16 = sbr.rel (!%p14_p3) target bundleno = 3 (0x3), region = 71 }
 0x280   :  { %2248 = vsyncpa [#allocation3], 1 }
 0x281   :  { %2250 = vsyncpa [#allocation3 + $0x1], 1 }

</bundles_post_ra>
